<compile_context>
chip_gen: v6e
topology: v6e:2x2x1
jax: 0.10.0
libtpu: 0.0.40
codegen_flags: <defaults>
</compile_context>

<pallas_src>
import math

import jax
import jax.numpy as jnp
from jax.experimental import pallas as pl
from jax.experimental.pallas import tpu as pltpu


# ----------------------------- kernel ----------------------------------------

def _make_mlp_kernel(n_layers):
    """Fused MLP kernel: refs = (x, w1, b1, ..., wL, bL, out)."""

    def kernel(*refs):
        x_ref = refs[0]
        o_ref = refs[-1]
        h = x_ref[...]                                 # f32 activations
        for i in range(n_layers):                      # unrolled at trace time
            w_ref = refs[1 + 2 * i]                    # bf16, padded
            b_ref = refs[2 + 2 * i]                    # f32, padded (last has -1e30 mask)
            y = jnp.dot(h.astype(jnp.bfloat16), w_ref[...],
                        preferred_element_type=jnp.float32)
            y = y + b_ref[...]                         # (1, out) sublane broadcast
            if i < n_layers - 1:
                h = jnp.maximum(y, 0.0)                # ReLU (padded lanes stay 0)
            else:
                # Stable softmax; padded lanes carry -1e30 from the bias and
                # exp-underflow to exactly 0, so they don't affect the sum.
                m = jnp.max(y, axis=-1, keepdims=True)
                e = jnp.exp(y - m)
                s = jnp.sum(e, axis=-1, keepdims=True)
                # Exact normalization (approx reciprocal broke the 1e-5 row-sum check).
                o_ref[...] = (e / s).astype(o_ref.dtype)

    return kernel


# ----------------------------- wrapper ----------------------------------------

def _round_up(x, m):
    return ((x + m - 1) // m) * m


def init_mlp_params(key, layer_sizes, dtype=jnp.float32):
    """Deterministic init matching torch.nn.Linear's default:
    U(-1/sqrt(fan_in), 1/sqrt(fan_in)) for both weight and bias.
    Weights are (in_features, out_features)."""
    params = []
    for i in range(len(layer_sizes) - 1):
        fan_in, fan_out = layer_sizes[i], layer_sizes[i + 1]
        key, kw, kb = jax.random.split(key, 3)
        bound = 1.0 / math.sqrt(fan_in)
        w = jax.random.uniform(kw, (fan_in, fan_out), dtype, -bound, bound)
        b = jax.random.uniform(kb, (1, fan_out), dtype, -bound, bound)
        params.append((w, b))
    return params


def prepare_mlp_params(params, layer_sizes):
    """One-time preparation: pad feature dims to multiples of 128, cast weights
    to bf16 (halves weight DMA, ~2-3x MXU throughput), keep biases in f32, and
    bake the softmax lane mask (-1e30) into the padded lanes of the LAST bias."""
    d_in = layer_sizes[0]
    padded_sizes = [d_in] + [_round_up(s, 128) for s in layer_sizes[1:]]
    n_layers = len(params)
    prepared = []
    for i, (w, b) in enumerate(params):
        pi, po = padded_sizes[i], padded_sizes[i + 1]
        wp = jnp.zeros((pi, po), jnp.float32).at[: w.shape[0], : w.shape[1]].set(w)
        wp = wp.astype(jnp.bfloat16)
        if i == n_layers - 1:
            bp = jnp.full((1, po), -1e30, jnp.float32).at[:, : b.shape[1]].set(b)
        else:
            bp = jnp.zeros((1, po), jnp.float32).at[:, : b.shape[1]].set(b)
        prepared.append((wp, bp))
    return prepared, padded_sizes


def mlp_forward(x, prepared_params, layer_sizes, padded_sizes, tm=1024):
    """Fused MLP forward. x is flattened to (-1, layer_sizes[0]) like the
    PyTorch module; returns (N, layer_sizes[-1]) softmax probabilities."""
    d_in = layer_sizes[0]
    d_out = layer_sizes[-1]
    d_out_pad = padded_sizes[-1]
    n_layers = len(prepared_params)

    x = x.reshape(-1, d_in)
    n = x.shape[0]

    # ---- row tiling: pad rows so the grid divides evenly --------------------
    # TODO(synk): for very large batches on v7x, keep at least 2 (even) grid
    # tiles so the "parallel" axis shards across both TensorCores.
    tm = min(tm, _round_up(n, 8))
    n_pad = _round_up(n, tm)
    if n_pad != n:
        x = jnp.zeros((n_pad, d_in), x.dtype).at[:n].set(x)

    flat_args = [x]
    in_specs = [pl.BlockSpec((tm, d_in), lambda i: (i, 0))]
    for wp, bp in prepared_params:
        flat_args += [wp, bp]
        # TODO(synk): grid-invariant weights/biases could use
        # pipeline_mode=pl.Buffered(1) (or a one-shot DMA into scratch) to halve
        # their resident VMEM copies; matters once layer widths grow (v7x 64 MiB).
        in_specs.append(pl.BlockSpec(wp.shape, lambda i: (0, 0)))
        in_specs.append(pl.BlockSpec(bp.shape, lambda i: (0, 0)))

    # ---- explicit VMEM budget so large row tiles don't trip scoped defaults --
    max_pad = max(padded_sizes)
    bytes_needed = (
        2 * tm * d_in * x.dtype.itemsize                       # input tile x2 (pipeline)
        + sum(2 * (wp.size * wp.dtype.itemsize + bp.size * bp.dtype.itemsize)
              for wp, bp in prepared_params)                   # params x2 (pipeline)
        + 2 * tm * d_out_pad * 4                               # output tile x2
        + 4 * tm * max_pad * 4                                 # activation working set
    )
    vmem_limit = int(min(bytes_needed + (4 << 20), 48 << 20))  # stay under v7x 64 MiB

    # TODO(synk): optionally emit the (lane-padded) output in bf16 to halve the
    # padded HBM writeback; kept f32 here so the softmax checks stay tight.
    out = pl.pallas_call(
        _make_mlp_kernel(n_layers),
        out_shape=jax.ShapeDtypeStruct((n_pad, d_out_pad), x.dtype),
        grid=(n_pad // tm,),
        in_specs=in_specs,
        out_specs=pl.BlockSpec((tm, d_out_pad), lambda i: (i, 0)),
        compiler_params=pltpu.CompilerParams(
            dimension_semantics=("parallel",),
            vmem_limit_bytes=vmem_limit,
        ),
    )(*flat_args)

    # Drop row/lane padding.
    return out[:n, :d_out]


# ----------------------------- reference --------------------------------------

def mlp_reference(x, params, layer_sizes):
    """Pure-JAX reference with the same bf16-operand / f32-accumulate matmuls."""
    x = x.reshape(-1, layer_sizes[0])
    for i, (w, b) in enumerate(params):
        y = jnp.dot(x.astype(jnp.bfloat16), w.astype(jnp.bfloat16),
                    preferred_element_type=jnp.float32) + b
        if i < len(params) - 1:
            x = jnp.maximum(y, 0.0)
        else:
            x = jax.nn.softmax(y, axis=-1)
    return x


# ----------------------------- main --------------------------------------------

if __name__ == "__main__":
    layer_sizes = [64, 128, 32, 16]

    key = jax.random.PRNGKey(0)
    key_x, key_p = jax.random.split(key)

    # Input (2, 4, 16) -> view(-1, 64) -> (2, 64)
    x = jax.random.normal(key_x, (2, 4, 16), dtype=jnp.float32)
    params = init_mlp_params(key_p, layer_sizes)

    # One-time parameter preparation (padding + bf16 cast + baked softmax mask).
    prepared, padded_sizes = prepare_mlp_params(params, layer_sizes)

    out = mlp_forward(x, prepared, layer_sizes, padded_sizes)
    out = jax.block_until_ready(out)

    assert out.shape == (2, layer_sizes[-1])
    # softmax rows must sum to ~1 (exact normalization now).
    assert jnp.allclose(jnp.sum(out, axis=-1), 1.0, atol=1e-5)
    # match pure-JAX reference (same bf16-operand matmuls).
    ref = mlp_reference(x, params, layer_sizes)
    assert jnp.allclose(out, ref, atol=1e-4, rtol=1e-3)

    print("KERNEL_OK")
</pallas_src>

<mosaic_0001>
module attributes {stable_mosaic.version = 11 : i64} {
  func.func @kernel(%arg0: i32, %arg1: memref<8x64xf32, #tpu.memory_space<vmem>>, %arg2: memref<64x128xbf16, #tpu.memory_space<vmem>>, %arg3: memref<1x128xf32, #tpu.memory_space<vmem>>, %arg4: memref<128x128xbf16, #tpu.memory_space<vmem>>, %arg5: memref<1x128xf32, #tpu.memory_space<vmem>>, %arg6: memref<128x128xbf16, #tpu.memory_space<vmem>>, %arg7: memref<1x128xf32, #tpu.memory_space<vmem>>, %arg8: memref<8x128xf32, #tpu.memory_space<vmem>>) attributes {dimension_semantics = [#tpu.dimension_semantics<parallel>], iteration_bounds = array<i64: 1>, scalar_prefetch = 0 : i64, scratch_operands = 0 : i64, tpu.core_type = #tpu.core_type<tc>, window_params = [{transform_indices = @transform_0, window_bounds = array<i64: 8, 64>}, {pipeline_mode = #tpu.pipeline_mode<synchronous>, transform_indices = @transform_1, window_bounds = array<i64: 64, 128>}, {pipeline_mode = #tpu.pipeline_mode<synchronous>, transform_indices = @transform_2, window_bounds = array<i64: 1, 128>}, {pipeline_mode = #tpu.pipeline_mode<synchronous>, transform_indices = @transform_3, window_bounds = array<i64: 128, 128>}, {pipeline_mode = #tpu.pipeline_mode<synchronous>, transform_indices = @transform_4, window_bounds = array<i64: 1, 128>}, {pipeline_mode = #tpu.pipeline_mode<synchronous>, transform_indices = @transform_5, window_bounds = array<i64: 128, 128>}, {pipeline_mode = #tpu.pipeline_mode<synchronous>, transform_indices = @transform_6, window_bounds = array<i64: 1, 128>}, {transform_indices = @transform_7, window_bounds = array<i64: 8, 128>}]} {
    %c0 = arith.constant 0 : index
    %c0_0 = arith.constant 0 : index
    %0 = vector.load %arg1[%c0, %c0_0] : memref<8x64xf32, #tpu.memory_space<vmem>>, vector<8x64xf32>
    %1 = arith.truncf %0 : vector<8x64xf32> to vector<8x64xbf16>
    %c0_1 = arith.constant 0 : index
    %c0_2 = arith.constant 0 : index
    %2 = vector.load %arg2[%c0_1, %c0_2] : memref<64x128xbf16, #tpu.memory_space<vmem>>, vector<64x128xbf16>
    %cst = arith.constant dense<0.000000e+00> : vector<8x128xf32>
    %3 = tpu.matmul %1, %2, %cst {dimension_numbers = #tpu.dot_dimension_numbers<[1], [0], [0], [1], [0, 0, 1, 1], [], []>} : vector<8x64xbf16>, vector<64x128xbf16>, vector<8x128xf32> -> vector<8x128xf32>
    %c0_3 = arith.constant 0 : index
    %c0_4 = arith.constant 0 : index
    %4 = vector.load %arg3[%c0_3, %c0_4] : memref<1x128xf32, #tpu.memory_space<vmem>>, vector<1x128xf32>
    %5 = vector.broadcast %4 : vector<1x128xf32> to vector<8x128xf32>
    %6 = arith.addf %3, %5 : vector<8x128xf32>
    %cst_5 = arith.constant 0.000000e+00 : f32
    %7 = vector.broadcast %cst_5 : f32 to vector<8x128xf32>
    %8 = arith.maximumf %6, %7 : vector<8x128xf32>
    %9 = arith.truncf %8 : vector<8x128xf32> to vector<8x128xbf16>
    %c0_6 = arith.constant 0 : index
    %c0_7 = arith.constant 0 : index
    %10 = vector.load %arg4[%c0_6, %c0_7] : memref<128x128xbf16, #tpu.memory_space<vmem>>, vector<128x128xbf16>
    %cst_8 = arith.constant dense<0.000000e+00> : vector<8x128xf32>
    %11 = tpu.matmul %9, %10, %cst_8 {dimension_numbers = #tpu.dot_dimension_numbers<[1], [0], [0], [1], [0, 0, 1, 1], [], []>} : vector<8x128xbf16>, vector<128x128xbf16>, vector<8x128xf32> -> vector<8x128xf32>
    %c0_9 = arith.constant 0 : index
    %c0_10 = arith.constant 0 : index
    %12 = vector.load %arg5[%c0_9, %c0_10] : memref<1x128xf32, #tpu.memory_space<vmem>>, vector<1x128xf32>
    %13 = vector.broadcast %12 : vector<1x128xf32> to vector<8x128xf32>
    %14 = arith.addf %11, %13 : vector<8x128xf32>
    %cst_11 = arith.constant 0.000000e+00 : f32
    %15 = vector.broadcast %cst_11 : f32 to vector<8x128xf32>
    %16 = arith.maximumf %14, %15 : vector<8x128xf32>
    %17 = arith.truncf %16 : vector<8x128xf32> to vector<8x128xbf16>
    %c0_12 = arith.constant 0 : index
    %c0_13 = arith.constant 0 : index
    %18 = vector.load %arg6[%c0_12, %c0_13] : memref<128x128xbf16, #tpu.memory_space<vmem>>, vector<128x128xbf16>
    %cst_14 = arith.constant dense<0.000000e+00> : vector<8x128xf32>
    %19 = tpu.matmul %17, %18, %cst_14 {dimension_numbers = #tpu.dot_dimension_numbers<[1], [0], [0], [1], [0, 0, 1, 1], [], []>} : vector<8x128xbf16>, vector<128x128xbf16>, vector<8x128xf32> -> vector<8x128xf32>
    %c0_15 = arith.constant 0 : index
    %c0_16 = arith.constant 0 : index
    %20 = vector.load %arg7[%c0_15, %c0_16] : memref<1x128xf32, #tpu.memory_space<vmem>>, vector<1x128xf32>
    %21 = vector.broadcast %20 : vector<1x128xf32> to vector<8x128xf32>
    %22 = arith.addf %19, %21 : vector<8x128xf32>
    %cst_17 = arith.constant dense<0xFF800000> : vector<8xf32>
    %23 = vector.multi_reduction <maximumf>, %22, %cst_17 [1] : vector<8x128xf32> to vector<8xf32>
    %24 = vector.shape_cast %23 : vector<8xf32> to vector<8x1xf32>
    %25 = vector.broadcast %24 : vector<8x1xf32> to vector<8x128xf32>
    %26 = arith.subf %22, %25 : vector<8x128xf32>
    %27 = math.exp %26 : vector<8x128xf32>
    %cst_18 = arith.constant dense<0.000000e+00> : vector<8xf32>
    %28 = vector.multi_reduction <add>, %27, %cst_18 [1] : vector<8x128xf32> to vector<8xf32>
    %29 = vector.shape_cast %28 : vector<8xf32> to vector<8x1xf32>
    %30 = vector.broadcast %29 : vector<8x1xf32> to vector<8x128xf32>
    %31 = arith.divf %27, %30 : vector<8x128xf32>
    %c0_19 = arith.constant 0 : index
    %c0_20 = arith.constant 0 : index
    %32 = vector.load %arg8[%c0_19, %c0_20] : memref<8x128xf32, #tpu.memory_space<vmem>>, vector<8x128xf32>
    tpu.vector_store %arg8[%c0_19, %c0_20], %31 {strides = array<i32>} : memref<8x128xf32, #tpu.memory_space<vmem>>, vector<8x128xf32>,
    return
  }
  func.func @transform_0(%arg0: i32) -> (i32, i32) {
    %c0_i32 = arith.constant 0 : i32
    %c0_i32_0 = arith.constant 0 : i32
    return %arg0, %c0_i32 : i32, i32
  }
  func.func @transform_1(%arg0: i32) -> (i32, i32) {
    %c0_i32 = arith.constant 0 : i32
    %c0_i32_0 = arith.constant 0 : i32
    %c0_i32_1 = arith.constant 0 : i32
    return %c0_i32, %c0_i32_0 : i32, i32
  }
  func.func @transform_2(%arg0: i32) -> (i32, i32) {
    %c0_i32 = arith.constant 0 : i32
    %c0_i32_0 = arith.constant 0 : i32
    %c0_i32_1 = arith.constant 0 : i32
    return %c0_i32, %c0_i32_0 : i32, i32
  }
  func.func @transform_3(%arg0: i32) -> (i32, i32) {
    %c0_i32 = arith.constant 0 : i32
    %c0_i32_0 = arith.constant 0 : i32
    %c0_i32_1 = arith.constant 0 : i32
    return %c0_i32, %c0_i32_0 : i32, i32
  }
  func.func @transform_4(%arg0: i32) -> (i32, i32) {
    %c0_i32 = arith.constant 0 : i32
    %c0_i32_0 = arith.constant 0 : i32
    %c0_i32_1 = arith.constant 0 : i32
    return %c0_i32, %c0_i32_0 : i32, i32
  }
  func.func @transform_5(%arg0: i32) -> (i32, i32) {
    %c0_i32 = arith.constant 0 : i32
    %c0_i32_0 = arith.constant 0 : i32
    %c0_i32_1 = arith.constant 0 : i32
    return %c0_i32, %c0_i32_0 : i32, i32
  }
  func.func @transform_6(%arg0: i32) -> (i32, i32) {
    %c0_i32 = arith.constant 0 : i32
    %c0_i32_0 = arith.constant 0 : i32
    %c0_i32_1 = arith.constant 0 : i32
    return %c0_i32, %c0_i32_0 : i32, i32
  }
  func.func @transform_7(%arg0: i32) -> (i32, i32) {
    %c0_i32 = arith.constant 0 : i32
    %c0_i32_0 = arith.constant 0 : i32
    return %arg0, %c0_i32 : i32, i32
  }
}

</mosaic_0001>

<bundles_post_ra>
// kernel: tpu_custom_call.1
= control target key start
LH: loop header
LB: loop body
LE: loop exit
PB: predicated region body
PF: predicated region fallthrough
CT: control target
= control target key end

     0   :  { %12 = vsyncpa [#allocation3], 0  ;;  %s767_s0 = inlined_call_operand.hbm [shape: f32[8,64], index: 0, kind: input, shape index: {}]   ;;  %s768_s1 = inlined_call_operand.hbm [shape: bf16[64,128], index: 1, kind: input, shape index: {}]   ;;  %s769_s2 = inlined_call_operand.vmem [shape: f32[1,128], index: 2, kind: input, shape index: {}]   ;;  %s770_s3 = inlined_call_operand.hbm [shape: bf16[128,128], index: 3, kind: input, shape index: {}]   ;;  %s771_s4 = inlined_call_operand.vmem [shape: f32[1,128], index: 4, kind: input, shape index: {}]   ;;  %s772_s5 = inlined_call_operand.hbm [shape: bf16[128,128], index: 5, kind: input, shape index: {}]   ;;  %s773_s6 = inlined_call_operand.vmem [shape: f32[1,128], index: 6, kind: input, shape index: {}]   ;;  %s774_s7 = inlined_call_operand.hbm [shape: f32[8,128], index: 7, kind: output, shape index: {}]  }
   0x1   :  { %13 = vsyncpa [#allocation6], 0 }
   0x2   :  { %14 = vsyncpa [#allocation9], 0 }
   0x3   :  { %15 = vsyncpa [#allocation4], 0  ;;  %s659_s24 = smov [#allocation5]  }
   0x4   :  { %s31_s25 = sshll.u32 %s659_s24, 4  ;;  %s32_s25 = int_to_ptr.vmem [resolvable:$true] %s31_s25 }
   0x5   :  { %s559_s26 = scalar_lea.vmem %s32_s25, 512  ;;  %p564_p1 = scmp.lt.s32.totalorder %s32_s25, %s32_s25 }
   0x6   :  { %p560_p0 = scmp.ne.s32.totalorder %s32_s25, %s559_s26  ;;  %p565_p2 = scmp.lt.s32.totalorder %s559_s26, %s559_s26 }
   0x8   :  { %p566_p3 = por %p565_p2, %p564_p1 }
   0xa   :  { %p567_p4 = pnand %p566_p3, %p560_p0 }
   0xc   :  { %570 = shalt.err (!%p567_p4)
}
   0xd   :  { %s660_s27 = smov 64   ;;  %s661_s28 = smov 4  }
   0xe   :  { %37 = dma.hbm_to_vmem [thread:$0]  %s768_s1, 512, %s32_s25, [#allocation6], %s660_s27, %s660_s27, %s661_s28  }
   0xf   :  { %s662_s8 = smov [#allocation2]   ;;  %s663_s10 = smov [#allocation7]  }
  0x10   :  { %s22_s9 = sshll.u32 %s662_s8, 4  ;;  %s45_s11 = sshll.u32 %s663_s10, 4  ;;  %s23_s9 = int_to_ptr.vmem [resolvable:$true] %s22_s9  ;;  %s46_s11 = int_to_ptr.vmem [resolvable:$true] %s45_s11 }
  0x11   :  { %s579_s12 = scalar_lea.vmem %s23_s9, 128  ;;  %p584_p6 = scmp.lt.s32.totalorder %s23_s9, %s23_s9 }
  0x12   :  { %p580_p5 = scmp.ne.s32.totalorder %s23_s9, %s579_s12  ;;  %p585_p7 = scmp.lt.s32.totalorder %s579_s12, %s579_s12 }
  0x14   :  { %p586_p8 = por %p585_p7, %p584_p6 }
  0x16   :  { %p587_p9 = pnand %p586_p8, %p580_p5 }
  0x18   :  { %590 = shalt.err (!%p587_p9)
}
  0x19   :  { %25 = dma.hbm_to_vmem [thread:$0]  %s767_s0, 128, %s23_s9, [#allocation3]  }
  0x1a   :  { %s599_s15 = scalar_lea.vmem %s46_s11, 1024  ;;  %p604_p11 = scmp.lt.s32.totalorder %s46_s11, %s46_s11 }
  0x1b   :  { %p600_p10 = scmp.ne.s32.totalorder %s46_s11, %s599_s15  ;;  %p605_p12 = scmp.lt.s32.totalorder %s599_s15, %s599_s15 }
  0x1d   :  { %p606_p13 = por %p605_p12, %p604_p11 }
  0x1f   :  { %p607_p0 = pnand %p606_p13, %p600_p10 }
  0x21   :  { %610 = shalt.err (!%p607_p0)
}
  0x22   :  { %51 = dma.hbm_to_vmem [thread:$0]  %s770_s3, 1024, %s46_s11, [#allocation6], %s660_s27, %s660_s27, %s661_s28  }
  0x23   :  { %s664_s17 = smov [#allocation8]  }
  0x24   :  { %s59_s18 = sshll.u32 %s664_s17, 4  ;;  %s60_s18 = int_to_ptr.vmem [resolvable:$true] %s59_s18 }
  0x25   :  { %s619_s19 = scalar_lea.vmem %s60_s18, 1024  ;;  %p624_p2 = scmp.lt.s32.totalorder %s60_s18, %s60_s18 }
  0x26   :  { %p620_p1 = scmp.ne.s32.totalorder %s60_s18, %s619_s19  ;;  %p625_p3 = scmp.lt.s32.totalorder %s619_s19, %s619_s19 }
  0x28   :  { %p626_p4 = por %p625_p3, %p624_p2 }
  0x2a   :  { %p627_p5 = pnand %p626_p4, %p620_p1 }
  0x2c   :  { %630 = shalt.err (!%p627_p5)
}
  0x2d   :  { %65 = dma.hbm_to_vmem [thread:$0]  %s772_s5, 1024, %s60_s18, [#allocation9], %s660_s27, %s660_s27, %s661_s28  }
  0x2e   :  { %651 = dma.done.wait [#allocation3], 128  }
  0x2f   :  { %652 = vsyncadd [#allocation3], 4294967168 }
  0x30   :  { %653 = dma.done.wait [#allocation6], 1536  }
  0x31   :  { %654 = vsyncadd [#allocation6], 4294965760 }
  0x32   :  { %655 = dma.done.wait [#allocation9], 1024  }
  0x33   :  { %656 = vsyncadd [#allocation9], 4294966272  ;;  %v665_v0 = vmov 0.0   ;;  %vm666_vm0 = vmmov 0   ;;  %v527_v1 = vld [vmem:[#allocation5 + $0x18] sm:$0xff]   ;;  %v528_v2 = vld [vmem:[#allocation5 + $0x10] sm:$0xff]  }
  0x34   :  { %466 = vmatprep.subr.bf16.mxu0 %v665_v0  ;;  %474 = vmatprep.mubr.msk.bf16.mxu0 %vm666_vm0, %v665_v0  ;;  %v531_v3 = vld [vmem:[#allocation7 + $0x38] sm:$0xff]   ;;  %v529_v4 = vld [vmem:[#allocation5 + $0x8] sm:$0xff]   ;;  %v532_v5 = vld [vmem:[#allocation7 + $0x30] sm:$0xff]   ;;  %vm122_vm1 = vcmask 523264  }
  0x35   :  { %478 = vmatprep.subr.bf16.mxu1 %v665_v0  ;;  %494 = vmatprep.mubr.msk.bf16.mxu1 %vm666_vm0, %v665_v0  ;;  %v530_v6 = vld [vmem:[#allocation5] sm:$0xff]   ;;  %v81_v7 = vld [vmem:[#allocation2] sm:$0xff]  ;;  %v533_v8 = vld [vmem:[#allocation7 + $0x28] sm:$0xff]  }
  0x36   :  { %467 = vmatpush3.bf16.msra.mxu0 %v527_v1  ;;  %479 = vmatpush3.bf16.msra.mxu1 %v531_v3  ;;  %v82_v9 = vpack.c.bf16 %v81_v7, %v81_v7  ;;  %v534_v10 = vld [vmem:[#allocation7 + $0x20] sm:$0xff]   ;;  %v535_v11 = vld [vmem:[#allocation7 + $0x18] sm:$0xff]   ;;  %v536_v12 = vld [vmem:[#allocation7 + $0x10] sm:$0xff]  }
  0x37   :  { %468 = vmatprep.subr.bf16.mxu0 %v665_v0  ;;  %480 = vmatprep.subr.bf16.mxu1 %v665_v0  ;;  %v537_v13 = vld [vmem:[#allocation7 + $0x8] sm:$0xff]   ;;  %v538_v14 = vld [vmem:[#allocation7] sm:$0xff]   ;;  %v539_v15 = vld [vmem:[#allocation8 + $0x38] sm:$0xff]  }
  0x38   :  { %v540_v16 = vld [vmem:[#allocation8 + $0x30] sm:$0xff]   ;;  %v541_v17 = vld [vmem:[#allocation8 + $0x28] sm:$0xff]   ;;  %v542_v18 = vld [vmem:[#allocation8 + $0x20] sm:$0xff]  }
  0x39   :  { %v543_v19 = vld [vmem:[#allocation8 + $0x18] sm:$0xff]   ;;  %v544_v20 = vld [vmem:[#allocation8 + $0x10] sm:$0xff]   ;;  %v545_v29 = vld [vmem:[#allocation8 + $0x8] sm:$0xff]  }
  0x3a   :  { %469 = vmatpush3.bf16.msra.mxu0 %v528_v2  ;;  %481 = vmatpush3.bf16.msra.mxu1 %v532_v5  ;;  %v419_v21 = vld [vmem:[%s769_s2] ss:$0 sm:$0xff]  ;;  %v546_v30 = vld [vmem:[#allocation8] sm:$0xff]  }
  0x3b   :  { %470 = vmatprep.subr.bf16.mxu0 %v665_v0  ;;  %482 = vmatprep.subr.bf16.mxu1 %v665_v0  ;;  %v425_v31 = vld [vmem:[%s771_s4] ss:$0 sm:$0xff]  ;;  %s667_s4 = smov [#allocation10]  }
  0x3c   :  { %v434_v39 = vld [vmem:[%s773_s6] ss:$0 sm:$0xff]  ;;  %s408_s24 = sshll.u32 %s667_s4, 4  ;;  %s409_s24 = int_to_ptr.vmem [resolvable:$true] %s408_s24 }
  0x3d   :  { %s631_s6 = scalar_lea.vmem %s409_s24, 128  ;;  %p636_p7 = scmp.lt.s32.totalorder %s409_s24, %s409_s24 }
  0x3e   :  { %471 = vmatpush3.bf16.msra.mxu0 %v529_v4  ;;  %483 = vmatpush3.bf16.msra.mxu1 %v533_v8  ;;  %p632_p6 = scmp.ne.s32.totalorder %s409_s24, %s631_s6  ;;  %p637_p8 = scmp.lt.s32.totalorder %s631_s6, %s631_s6 }
  0x3f   :  { %472 = vmatprep.subr.bf16.mxu0 %v665_v0  ;;  %484 = vmatprep.subr.bf16.mxu1 %v665_v0 }
  0x40   :  { %p638_p9 = por %p637_p8, %p636_p7 }
  0x42   :  { %473 = vmatpush3.bf16.msra.mxu0 %v530_v6  ;;  %485 = vmatpush3.bf16.msra.mxu1 %v534_v10  ;;  %p639_p10 = pnand %p638_p9, %p632_p6 }
  0x43   :  { %498 = vmatprep.subr.bf16.mxu0 %v665_v0  ;;  %486 = vmatprep.subr.bf16.mxu1 %v665_v0 }
  0x45   :  { %475 = vmatmul.mubr.msk.bf16.vlgmr.msra.gmra.mxu0 %vm122_vm1, %v82_v9 }
  0x46   :  { %514 = vmatprep.mubr.msk.bf16.mxu0 %vm666_vm0, %v665_v0  ;;  %487 = vmatpush3.bf16.msra.mxu1 %v535_v11 }
  0x47   :  { %488 = vmatprep.subr.bf16.mxu1 %v665_v0  ;;  %499 = vmatpush3.bf16.msra.mxu0 %v539_v15 }
  0x48   :  { %500 = vmatprep.subr.bf16.mxu0 %v665_v0 }
  0x4a   :  { %489 = vmatpush3.bf16.msra.mxu1 %v536_v12 }
  0x4b   :  { %490 = vmatprep.subr.bf16.mxu1 %v665_v0  ;;  %501 = vmatpush3.bf16.msra.mxu0 %v540_v16 }
  0x4c   :  { %502 = vmatprep.subr.bf16.mxu0 %v665_v0 }
  0x4e   :  { %491 = vmatpush3.bf16.msra.mxu1 %v537_v13 }
  0x4f   :  { %492 = vmatprep.subr.bf16.mxu1 %v665_v0  ;;  %503 = vmatpush3.bf16.msra.mxu0 %v541_v17 }
  0x50   :  { %504 = vmatprep.subr.bf16.mxu0 %v665_v0 }
  0x52   :  { %493 = vmatpush3.bf16.msra.mxu1 %v538_v14 }
  0x53   :  { %505 = vmatpush3.bf16.msra.mxu0 %v542_v18 }
  0x54   :  { %506 = vmatprep.subr.bf16.mxu0 %v665_v0 }
  0x57   :  { %507 = vmatpush3.bf16.msra.mxu0 %v543_v19 }
  0x58   :  { %508 = vmatprep.subr.bf16.mxu0 %v665_v0 }
  0x5b   :  { %509 = vmatpush3.bf16.msra.mxu0 %v544_v20 }
  0x5c   :  { %510 = vmatprep.subr.bf16.mxu0 %v665_v0 }
  0x5f   :  { %511 = vmatpush3.bf16.msra.mxu0 %v545_v29 }
  0x60   :  { %512 = vmatprep.subr.bf16.mxu0 %v665_v0 }
  0x63   :  { %513 = vmatpush3.bf16.msra.mxu0 %v546_v30 }
 0x105   :  { %v160_v22 = vpop.f32.mrf.mxu0 }
 0x106   :  { %v161_v23 = vadd.f32 %v419_v21, %v160_v22 }
 0x107   :  { %v476_v24 = vpop.f32.mrf.mxu0 }
 0x108   :  { %v166_v25 = vmax.f32 %v161_v23, 0.0 }
 0x109   :  { %v163_v26 = vpop.f32.mrf.mxu0 }
 0x10a   :  { %v167_v27 = vpack.c.bf16 %v166_v25, %v166_v25 }
 0x10b   :  { %v477_v28 = vpop.f32.mrf.mxu0 }
 0x10c   :  { %495 = vmatmul.mubr.bf16.vlgmr.msra.gmra.mxu1 %v167_v27 }
 0x1cc   :  { %v273_v32 = vpop.f32.mrf.mxu1 }
 0x1cd   :  { %v274_v33 = vadd.f32 %v425_v31, %v273_v32 }
 0x1ce   :  { %v496_v34 = vpop.f32.mrf.mxu1 }
 0x1cf   :  { %v279_v35 = vmax.f32 %v274_v33, 0.0 }
 0x1d0   :  { %v276_v36 = vpop.f32.mrf.mxu1 }
 0x1d1   :  { %v280_v37 = vpack.c.bf16 %v279_v35, %v279_v35 }
 0x1d2   :  { %v497_v38 = vpop.f32.mrf.mxu1 }
 0x1d3   :  { %515 = vmatmul.mubr.bf16.vlgmr.msra.gmra.mxu0 %v280_v37 }
 0x293   :  { %v386_v40 = vpop.f32.mrf.mxu0 }
 0x294   :  { %v387_v41 = vadd.f32 %v434_v39, %v386_v40 }
 0x295   :  { %v516_v42 = vpop.f32.mrf.mxu0 }
 0x296   :  { %392 = vmax.xlane.f32.xlu0 %v387_v41 }
 0x297   :  { %v389_v43 = vpop.f32.mrf.mxu0 }
 0x299   :  { %v517_v44 = vpop.f32.mrf.mxu0 }
 0x31f   :  { %v393_v45 = vpop.xlane.xlu0 %392 }
 0x320   :  { %v394_v46 = vsub.f32 %v387_v41, %v393_v45 }
 0x322   :  { %v395_v47 = vmul.f32 1.442695, %v394_v46 }
 0x324   :  { %547 = vpow2.f32 %v395_v47 }
 0x331   :  { %v548_v48 = vpop.eup %547 }
 0x332   :  { %397 = vadd.xlane.f32.xlu0 %v548_v48 }
 0x3bb   :  { %v398_v49 = vpop.xlane.xlu0 %397 }
 0x3bc   :  { %549 = vrcp.f32 %v398_v49 }
 0x3c9   :  { %v550_v50 = vpop.eup %549 }
 0x3ca   :  { %v400_v51 = vmul.f32 %v550_v50, %v548_v48 }
 0x3cc   :  { %401 = vst [vmem:[#allocation10] sm:$0xff] %v400_v51 }
 0x3cd   :  { %642 = shalt.err (!%p639_p10)
}
 0x3ce   :  { %411 = dma.vmem_to_hbm [thread:$0]  %s409_s24, 128, %s774_s7, [#allocation4]  }
 0x3cf   :  { %657 = dma.done.wait [#allocation4], 128  }
 0x3d0   :  { %658 = vsyncadd [#allocation4], 4294967168 }
 0x3d1   :  { %415 = vsyncpa [#allocation3], 1 }
 0x3d2   :  { %416 = vsyncpa [#allocation6], 1 }
 0x3d3   :  { %417 = vsyncpa [#allocation9], 1 }
 0x3d4   :  { %418 = vsyncpa [#allocation4], 1 }

</bundles_post_ra>
